<compile_context>
chip_gen: v6e
topology: v6e:2x2x1
jax: 0.10.0
libtpu: 0.0.40
codegen_flags: <defaults>
</compile_context>

<pallas_src>
import jax
import jax.numpy as jnp
from jax.experimental import pallas as pl
from jax.experimental.pallas import tpu as pltpu


def _round_up(x, m):
    return (x + m - 1) // m * m


# ----------------------------------------------------------------------------
# Fused Pallas kernel: conv1 + LeakyReLU + conv2 + LeakyReLU + linear
# ----------------------------------------------------------------------------
def _fused_move_kernel(x0_ref, x1_ref, x2_ref, x3_ref,
                       w1_ref, b1_ref, w2_ref, b2_ref, wl_ref, bl_ref,
                       o_ref, he_ref, ho_ref):
    """One grid step = one batch element, full sequence.

    x{p}_ref : (T2+1, Cp)  bf16   phase-p rows of time-padded input:
                                  x_phase_p[m] = x_pad[4*m + p]
    w1_ref   : (4, Cp, Hp) bf16   conv1 per-tap weights (tap, in, out)
    w2_ref   : (4, Hp, Np) bf16   conv2 per-tap weights
    wl_ref   : (Np, Np)    bf16   linear weight (in, out)
    b*_ref   : (1, *)      f32    biases (padded lanes are zero)
    o_ref    : (T2, Np)    f32    output tile
    he/ho_ref: (T2+1, Hp)  f32    conv1 even/odd output rows + conv2 halo row
    """
    f32 = jnp.float32
    bf16 = jnp.bfloat16
    T2 = o_ref.shape[0]
    Hp = he_ref.shape[1]
    lo = pl.ds(0, T2)
    hi = pl.ds(1, T2)

    def lrelu(v):
        return jnp.where(v >= 0.0, v, 0.2 * v)

    # ---- Conv1 (k=4, s=2, p=1): h1[i] = sum_k x_pad[2i+k] @ W1[k] + b1 ------
    # even output rows h1[2m]: phases 0,1,2,3 at row m
    acc = jnp.dot(x0_ref[lo, :], w1_ref[0], preferred_element_type=f32)
    acc += jnp.dot(x1_ref[lo, :], w1_ref[1], preferred_element_type=f32)
    acc += jnp.dot(x2_ref[lo, :], w1_ref[2], preferred_element_type=f32)
    acc += jnp.dot(x3_ref[lo, :], w1_ref[3], preferred_element_type=f32)
    h1_even = lrelu(acc + b1_ref[...])

    # odd output rows h1[2m+1]: phases 2,3 at row m, phases 0,1 at row m+1
    acc = jnp.dot(x2_ref[lo, :], w1_ref[0], preferred_element_type=f32)
    acc += jnp.dot(x3_ref[lo, :], w1_ref[1], preferred_element_type=f32)
    acc += jnp.dot(x0_ref[hi, :], w1_ref[2], preferred_element_type=f32)
    acc += jnp.dot(x1_ref[hi, :], w1_ref[3], preferred_element_type=f32)
    h1_odd = lrelu(acc + b1_ref[...])

    # stage parity rows (+ conv2 zero-padding halo) in VMEM scratch:
    #   he = [h1_even[0..T2-1], 0]     ho = [0, h1_odd[0..T2-1]]
    # Only the single halo row of each buffer is zeroed (not the full buffer);
    # the remaining rows are fully overwritten below.
    zero_row = jnp.zeros((1, Hp), f32)
    he_ref[lo, :] = h1_even
    he_ref[pl.ds(T2, 1), :] = zero_row
    ho_ref[hi, :] = h1_odd
    ho_ref[pl.ds(0, 1), :] = zero_row

    # ---- Conv2: h2[j] = h1[2j-1]@W2_0 + h1[2j]@W2_1 + h1[2j+1]@W2_2
    #                   + h1[2j+2]@W2_3 + b2  (out-of-range rows are zero) ----
    acc = jnp.dot(ho_ref[lo, :].astype(bf16), w2_ref[0], preferred_element_type=f32)
    acc += jnp.dot(he_ref[lo, :].astype(bf16), w2_ref[1], preferred_element_type=f32)
    acc += jnp.dot(ho_ref[hi, :].astype(bf16), w2_ref[2], preferred_element_type=f32)
    acc += jnp.dot(he_ref[hi, :].astype(bf16), w2_ref[3], preferred_element_type=f32)
    h2 = lrelu(acc + b2_ref[...])

    # ---- Linear -------------------------------------------------------------
    out = jnp.dot(h2.astype(bf16), wl_ref[...], preferred_element_type=f32)
    o_ref[...] = (out + bl_ref[...]).astype(o_ref.dtype)


# ----------------------------------------------------------------------------
# Wrapper: padding / phase-split glue + pallas_call
# ----------------------------------------------------------------------------
def move_model_forward(x, params):
    """x: (B, T, input_size) f32 -> (B, T//4, output_size) f32."""
    B, T, Cin = x.shape
    # TODO(synk): handle sequence lengths not divisible by 4 (floor-length conv tails).
    assert T % 4 == 0, "fused kernel assumes seq length divisible by 4"
    H = params["conv1_b"].shape[0]
    O = params["conv2_b"].shape[0]
    Cp = _round_up(Cin, 128)
    Hp = _round_up(H, 128)
    Np = _round_up(O, 128)
    T2 = T // 4
    T2p1 = T2 + 1

    # channel pad + time pad (1 left / 3 right) + 4-phase split.  The phase
    # split is a strided view (total bytes == padded input), not im2col.
    xp = jnp.pad(x, ((0, 0), (1, 3), (0, Cp - Cin))).astype(jnp.bfloat16)
    phases = [xp[:, p::4, :] for p in range(4)]           # each (B, T2+1, Cp)

    # torch Conv1d weight (out, in, k) -> per-tap matmul weight (k, in, out)
    def conv_w(w, in_p, out_p):
        wt = jnp.transpose(w, (2, 1, 0))                  # (4, in, out)
        return jnp.pad(wt, ((0, 0), (0, in_p - w.shape[1]),
                            (0, out_p - w.shape[0]))).astype(jnp.bfloat16)

    def pad_b(b, n_p):
        return jnp.pad(b, (0, n_p - b.shape[0])).reshape(1, n_p).astype(jnp.float32)

    w1 = conv_w(params["conv1_w"], Cp, Hp)
    b1 = pad_b(params["conv1_b"], Hp)
    w2 = conv_w(params["conv2_w"], Hp, Np)
    b2 = pad_b(params["conv2_b"], Np)
    wl = jnp.pad(params["lin_w"].T, ((0, Np - O), (0, Np - O))).astype(jnp.bfloat16)
    bl = pad_b(params["lin_b"], Np)

    x_spec = pl.BlockSpec((None, T2p1, Cp), lambda b: (b, 0, 0))
    w3_spec = lambda s: pl.BlockSpec(s, lambda b: (0, 0, 0))   # resident 3-D weight
    w2_spec = lambda s: pl.BlockSpec(s, lambda b: (0, 0))      # resident 2-D weight/bias

    out = pl.pallas_call(
        _fused_move_kernel,
        out_shape=jax.ShapeDtypeStruct((B, T2, Np), jnp.float32),
        grid_spec=pltpu.PrefetchScalarGridSpec(
            num_scalar_prefetch=0,
            grid=(B,),
            in_specs=[x_spec, x_spec, x_spec, x_spec,
                      w3_spec((4, Cp, Hp)), w2_spec((1, Hp)),
                      w3_spec((4, Hp, Np)), w2_spec((1, Np)),
                      w2_spec((Np, Np)), w2_spec((1, Np))],
            out_specs=pl.BlockSpec((None, T2, Np), lambda b: (b, 0, 0)),
            scratch_shapes=[pltpu.VMEM((T2p1, Hp), jnp.float32),
                            pltpu.VMEM((T2p1, Hp), jnp.float32)]),
        compiler_params=pltpu.CompilerParams(
            dimension_semantics=("parallel",)),
    )(*phases, w1, b1, w2, b2, wl, bl)

    return out[:, :, :O]


# ----------------------------------------------------------------------------
# Pure-JAX f32 reference (mirrors the PyTorch module exactly)
# ----------------------------------------------------------------------------
def reference_forward(x, params):
    prec = jax.lax.Precision.HIGHEST

    def conv1d(h_ncw, w, b):
        y = jax.lax.conv_general_dilated(
            h_ncw, w, window_strides=(2,), padding=((1, 1),),
            dimension_numbers=("NCH", "OIH", "NCH"), precision=prec)
        return y + b[None, :, None]

    def lrelu(v):
        return jnp.where(v >= 0.0, v, 0.2 * v)

    h = x.transpose(0, 2, 1)                                   # (B, C, T)
    h = lrelu(conv1d(h, params["conv1_w"], params["conv1_b"]))
    h = lrelu(conv1d(h, params["conv2_w"], params["conv2_b"]))
    h = h.transpose(0, 2, 1)                                   # (B, T/4, C)
    return jnp.einsum("btc,oc->bto", h, params["lin_w"],
                      precision=prec) + params["lin_b"]


# ----------------------------------------------------------------------------
# Deterministic parameter init (synthetic stand-in for the torch checkpoint)
# ----------------------------------------------------------------------------
def init_params(key, input_size, hidden_size, output_size):
    ks = jax.random.split(key, 6)
    s = 0.02
    return {
        "conv1_w": s * jax.random.normal(ks[0], (hidden_size, input_size, 4), jnp.float32),
        "conv1_b": s * jax.random.normal(ks[1], (hidden_size,), jnp.float32),
        "conv2_w": s * jax.random.normal(ks[2], (output_size, hidden_size, 4), jnp.float32),
        "conv2_b": s * jax.random.normal(ks[3], (output_size,), jnp.float32),
        "lin_w":   s * jax.random.normal(ks[4], (output_size, output_size), jnp.float32),
        "lin_b":   s * jax.random.normal(ks[5], (output_size,), jnp.float32),
    }


if __name__ == "__main__":
    # Small shapes consistent with the module's forward:
    # inputs (batch, seq, input_size) -> output (batch, seq // 4, output_size)
    B, T = 2, 16
    input_size, hidden_size, output_size = 24, 32, 32

    key = jax.random.PRNGKey(0)
    kx, kp = jax.random.split(key)
    x = jax.random.normal(kx, (B, T, input_size), jnp.float32)
    params = init_params(kp, input_size, hidden_size, output_size)

    fwd = jax.jit(move_model_forward)
    out = jax.block_until_ready(fwd(x, params))
    assert out.shape == (B, T // 4, output_size), out.shape

    ref = jax.block_until_ready(reference_forward(x, params))
    # bf16 MXU inputs with f32 accumulation vs. f32 reference
    max_err = float(jnp.max(jnp.abs(out - ref)))
    assert jnp.allclose(out, ref, rtol=3e-2, atol=3e-3), max_err

    print("KERNEL_OK")
</pallas_src>

<mosaic_0001>
module attributes {stable_mosaic.version = 11 : i64} {
  func.func @_fused_move_kernel(%arg0: i32, %arg1: memref<1x5x128xbf16, #tpu.memory_space<vmem>>, %arg2: memref<1x5x128xbf16, #tpu.memory_space<vmem>>, %arg3: memref<1x5x128xbf16, #tpu.memory_space<vmem>>, %arg4: memref<1x5x128xbf16, #tpu.memory_space<vmem>>, %arg5: memref<4x128x128xbf16, #tpu.memory_space<vmem>>, %arg6: memref<1x128xf32, #tpu.memory_space<vmem>>, %arg7: memref<4x128x128xbf16, #tpu.memory_space<vmem>>, %arg8: memref<1x128xf32, #tpu.memory_space<vmem>>, %arg9: memref<128x128xbf16, #tpu.memory_space<vmem>>, %arg10: memref<1x128xf32, #tpu.memory_space<vmem>>, %arg11: memref<1x4x128xf32, #tpu.memory_space<vmem>>, %arg12: memref<5x128xf32, #tpu.memory_space<vmem>>, %arg13: memref<5x128xf32, #tpu.memory_space<vmem>>) attributes {dimension_semantics = [#tpu.dimension_semantics<parallel>], iteration_bounds = array<i64: 2>, scalar_prefetch = 0 : i64, scratch_operands = 2 : i64, tpu.core_type = #tpu.core_type<tc>, window_params = [{transform_indices = @transform_0, window_bounds = array<i64: 1, 5, 128>}, {transform_indices = @transform_1, window_bounds = array<i64: 1, 5, 128>}, {transform_indices = @transform_2, window_bounds = array<i64: 1, 5, 128>}, {transform_indices = @transform_3, window_bounds = array<i64: 1, 5, 128>}, {pipeline_mode = #tpu.pipeline_mode<synchronous>, transform_indices = @transform_4, window_bounds = array<i64: 4, 128, 128>}, {pipeline_mode = #tpu.pipeline_mode<synchronous>, transform_indices = @transform_5, window_bounds = array<i64: 1, 128>}, {pipeline_mode = #tpu.pipeline_mode<synchronous>, transform_indices = @transform_6, window_bounds = array<i64: 4, 128, 128>}, {pipeline_mode = #tpu.pipeline_mode<synchronous>, transform_indices = @transform_7, window_bounds = array<i64: 1, 128>}, {pipeline_mode = #tpu.pipeline_mode<synchronous>, transform_indices = @transform_8, window_bounds = array<i64: 128, 128>}, {pipeline_mode = #tpu.pipeline_mode<synchronous>, transform_indices = @transform_9, window_bounds = array<i64: 1, 128>}, {transform_indices = @transform_10, window_bounds = array<i64: 1, 4, 128>}]} {
    %c0 = arith.constant 0 : index
    %c0_0 = arith.constant 0 : index
    %c0_1 = arith.constant 0 : index
    %0 = vector.load %arg1[%c0, %c0_0, %c0_1] : memref<1x5x128xbf16, #tpu.memory_space<vmem>>, vector<1x4x128xbf16>
    %1 = vector.shape_cast %0 : vector<1x4x128xbf16> to vector<4x128xbf16>
    %c0_2 = arith.constant 0 : index
    %c0_3 = arith.constant 0 : index
    %c0_4 = arith.constant 0 : index
    %2 = vector.load %arg5[%c0_2, %c0_3, %c0_4] : memref<4x128x128xbf16, #tpu.memory_space<vmem>>, vector<1x128x128xbf16>
    %3 = vector.shape_cast %2 : vector<1x128x128xbf16> to vector<128x128xbf16>
    %cst = arith.constant dense<0.000000e+00> : vector<4x128xf32>
    %4 = tpu.matmul %1, %3, %cst {dimension_numbers = #tpu.dot_dimension_numbers<[1], [0], [0], [1], [0, 0, 1, 1], [], []>} : vector<4x128xbf16>, vector<128x128xbf16>, vector<4x128xf32> -> vector<4x128xf32>
    %c0_5 = arith.constant 0 : index
    %c0_6 = arith.constant 0 : index
    %c0_7 = arith.constant 0 : index
    %5 = vector.load %arg2[%c0_5, %c0_6, %c0_7] : memref<1x5x128xbf16, #tpu.memory_space<vmem>>, vector<1x4x128xbf16>
    %6 = vector.shape_cast %5 : vector<1x4x128xbf16> to vector<4x128xbf16>
    %c1 = arith.constant 1 : index
    %c0_8 = arith.constant 0 : index
    %c0_9 = arith.constant 0 : index
    %7 = vector.load %arg5[%c1, %c0_8, %c0_9] : memref<4x128x128xbf16, #tpu.memory_space<vmem>>, vector<1x128x128xbf16>
    %8 = vector.shape_cast %7 : vector<1x128x128xbf16> to vector<128x128xbf16>
    %cst_10 = arith.constant dense<0.000000e+00> : vector<4x128xf32>
    %9 = tpu.matmul %6, %8, %cst_10 {dimension_numbers = #tpu.dot_dimension_numbers<[1], [0], [0], [1], [0, 0, 1, 1], [], []>} : vector<4x128xbf16>, vector<128x128xbf16>, vector<4x128xf32> -> vector<4x128xf32>
    %10 = arith.addf %4, %9 : vector<4x128xf32>
    %c0_11 = arith.constant 0 : index
    %c0_12 = arith.constant 0 : index
    %c0_13 = arith.constant 0 : index
    %11 = vector.load %arg3[%c0_11, %c0_12, %c0_13] : memref<1x5x128xbf16, #tpu.memory_space<vmem>>, vector<1x4x128xbf16>
    %12 = vector.shape_cast %11 : vector<1x4x128xbf16> to vector<4x128xbf16>
    %c2 = arith.constant 2 : index
    %c0_14 = arith.constant 0 : index
    %c0_15 = arith.constant 0 : index
    %13 = vector.load %arg5[%c2, %c0_14, %c0_15] : memref<4x128x128xbf16, #tpu.memory_space<vmem>>, vector<1x128x128xbf16>
    %14 = vector.shape_cast %13 : vector<1x128x128xbf16> to vector<128x128xbf16>
    %cst_16 = arith.constant dense<0.000000e+00> : vector<4x128xf32>
    %15 = tpu.matmul %12, %14, %cst_16 {dimension_numbers = #tpu.dot_dimension_numbers<[1], [0], [0], [1], [0, 0, 1, 1], [], []>} : vector<4x128xbf16>, vector<128x128xbf16>, vector<4x128xf32> -> vector<4x128xf32>
    %16 = arith.addf %10, %15 : vector<4x128xf32>
    %c0_17 = arith.constant 0 : index
    %c0_18 = arith.constant 0 : index
    %c0_19 = arith.constant 0 : index
    %17 = vector.load %arg4[%c0_17, %c0_18, %c0_19] : memref<1x5x128xbf16, #tpu.memory_space<vmem>>, vector<1x4x128xbf16>
    %18 = vector.shape_cast %17 : vector<1x4x128xbf16> to vector<4x128xbf16>
    %c3 = arith.constant 3 : index
    %c0_20 = arith.constant 0 : index
    %c0_21 = arith.constant 0 : index
    %19 = vector.load %arg5[%c3, %c0_20, %c0_21] : memref<4x128x128xbf16, #tpu.memory_space<vmem>>, vector<1x128x128xbf16>
    %20 = vector.shape_cast %19 : vector<1x128x128xbf16> to vector<128x128xbf16>
    %cst_22 = arith.constant dense<0.000000e+00> : vector<4x128xf32>
    %21 = tpu.matmul %18, %20, %cst_22 {dimension_numbers = #tpu.dot_dimension_numbers<[1], [0], [0], [1], [0, 0, 1, 1], [], []>} : vector<4x128xbf16>, vector<128x128xbf16>, vector<4x128xf32> -> vector<4x128xf32>
    %22 = arith.addf %16, %21 : vector<4x128xf32>
    %c0_23 = arith.constant 0 : index
    %c0_24 = arith.constant 0 : index
    %23 = vector.load %arg6[%c0_23, %c0_24] : memref<1x128xf32, #tpu.memory_space<vmem>>, vector<1x128xf32>
    %24 = vector.broadcast %23 : vector<1x128xf32> to vector<4x128xf32>
    %25 = arith.addf %22, %24 : vector<4x128xf32>
    %cst_25 = arith.constant 0.000000e+00 : f32
    %26 = vector.broadcast %cst_25 : f32 to vector<4x128xf32>
    %27 = arith.cmpf oge, %25, %26 : vector<4x128xf32>
    %cst_26 = arith.constant 2.000000e-01 : f32
    %28 = vector.broadcast %cst_26 : f32 to vector<4x128xf32>
    %29 = arith.mulf %28, %25 : vector<4x128xf32>
    %30 = arith.select %27, %25, %29 : vector<4x128xi1>, vector<4x128xf32>
    %c0_27 = arith.constant 0 : index
    %c0_28 = arith.constant 0 : index
    %c0_29 = arith.constant 0 : index
    %31 = vector.load %arg3[%c0_27, %c0_28, %c0_29] : memref<1x5x128xbf16, #tpu.memory_space<vmem>>, vector<1x4x128xbf16>
    %32 = vector.shape_cast %31 : vector<1x4x128xbf16> to vector<4x128xbf16>
    %c0_30 = arith.constant 0 : index
    %c0_31 = arith.constant 0 : index
    %c0_32 = arith.constant 0 : index
    %33 = vector.load %arg5[%c0_30, %c0_31, %c0_32] : memref<4x128x128xbf16, #tpu.memory_space<vmem>>, vector<1x128x128xbf16>
    %34 = vector.shape_cast %33 : vector<1x128x128xbf16> to vector<128x128xbf16>
    %cst_33 = arith.constant dense<0.000000e+00> : vector<4x128xf32>
    %35 = tpu.matmul %32, %34, %cst_33 {dimension_numbers = #tpu.dot_dimension_numbers<[1], [0], [0], [1], [0, 0, 1, 1], [], []>} : vector<4x128xbf16>, vector<128x128xbf16>, vector<4x128xf32> -> vector<4x128xf32>
    %c0_34 = arith.constant 0 : index
    %c0_35 = arith.constant 0 : index
    %c0_36 = arith.constant 0 : index
    %36 = vector.load %arg4[%c0_34, %c0_35, %c0_36] : memref<1x5x128xbf16, #tpu.memory_space<vmem>>, vector<1x4x128xbf16>
    %37 = vector.shape_cast %36 : vector<1x4x128xbf16> to vector<4x128xbf16>
    %c1_37 = arith.constant 1 : index
    %c0_38 = arith.constant 0 : index
    %c0_39 = arith.constant 0 : index
    %38 = vector.load %arg5[%c1_37, %c0_38, %c0_39] : memref<4x128x128xbf16, #tpu.memory_space<vmem>>, vector<1x128x128xbf16>
    %39 = vector.shape_cast %38 : vector<1x128x128xbf16> to vector<128x128xbf16>
    %cst_40 = arith.constant dense<0.000000e+00> : vector<4x128xf32>
    %40 = tpu.matmul %37, %39, %cst_40 {dimension_numbers = #tpu.dot_dimension_numbers<[1], [0], [0], [1], [0, 0, 1, 1], [], []>} : vector<4x128xbf16>, vector<128x128xbf16>, vector<4x128xf32> -> vector<4x128xf32>
    %41 = arith.addf %35, %40 : vector<4x128xf32>
    %c0_41 = arith.constant 0 : index
    %c1_42 = arith.constant 1 : index
    %c0_43 = arith.constant 0 : index
    %42 = vector.load %arg1[%c0_41, %c1_42, %c0_43] : memref<1x5x128xbf16, #tpu.memory_space<vmem>>, vector<1x4x128xbf16>
    %43 = vector.shape_cast %42 : vector<1x4x128xbf16> to vector<4x128xbf16>
    %c2_44 = arith.constant 2 : index
    %c0_45 = arith.constant 0 : index
    %c0_46 = arith.constant 0 : index
    %44 = vector.load %arg5[%c2_44, %c0_45, %c0_46] : memref<4x128x128xbf16, #tpu.memory_space<vmem>>, vector<1x128x128xbf16>
    %45 = vector.shape_cast %44 : vector<1x128x128xbf16> to vector<128x128xbf16>
    %cst_47 = arith.constant dense<0.000000e+00> : vector<4x128xf32>
    %46 = tpu.matmul %43, %45, %cst_47 {dimension_numbers = #tpu.dot_dimension_numbers<[1], [0], [0], [1], [0, 0, 1, 1], [], []>} : vector<4x128xbf16>, vector<128x128xbf16>, vector<4x128xf32> -> vector<4x128xf32>
    %47 = arith.addf %41, %46 : vector<4x128xf32>
    %c0_48 = arith.constant 0 : index
    %c1_49 = arith.constant 1 : index
    %c0_50 = arith.constant 0 : index
    %48 = vector.load %arg2[%c0_48, %c1_49, %c0_50] : memref<1x5x128xbf16, #tpu.memory_space<vmem>>, vector<1x4x128xbf16>
    %49 = vector.shape_cast %48 : vector<1x4x128xbf16> to vector<4x128xbf16>
    %c3_51 = arith.constant 3 : index
    %c0_52 = arith.constant 0 : index
    %c0_53 = arith.constant 0 : index
    %50 = vector.load %arg5[%c3_51, %c0_52, %c0_53] : memref<4x128x128xbf16, #tpu.memory_space<vmem>>, vector<1x128x128xbf16>
    %51 = vector.shape_cast %50 : vector<1x128x128xbf16> to vector<128x128xbf16>
    %cst_54 = arith.constant dense<0.000000e+00> : vector<4x128xf32>
    %52 = tpu.matmul %49, %51, %cst_54 {dimension_numbers = #tpu.dot_dimension_numbers<[1], [0], [0], [1], [0, 0, 1, 1], [], []>} : vector<4x128xbf16>, vector<128x128xbf16>, vector<4x128xf32> -> vector<4x128xf32>
    %53 = arith.addf %47, %52 : vector<4x128xf32>
    %c0_55 = arith.constant 0 : index
    %c0_56 = arith.constant 0 : index
    %54 = vector.load %arg6[%c0_55, %c0_56] : memref<1x128xf32, #tpu.memory_space<vmem>>, vector<1x128xf32>
    %55 = vector.broadcast %54 : vector<1x128xf32> to vector<4x128xf32>
    %56 = arith.addf %53, %55 : vector<4x128xf32>
    %cst_57 = arith.constant 0.000000e+00 : f32
    %57 = vector.broadcast %cst_57 : f32 to vector<4x128xf32>
    %58 = arith.cmpf oge, %56, %57 : vector<4x128xf32>
    %cst_58 = arith.constant 2.000000e-01 : f32
    %59 = vector.broadcast %cst_58 : f32 to vector<4x128xf32>
    %60 = arith.mulf %59, %56 : vector<4x128xf32>
    %61 = arith.select %58, %56, %60 : vector<4x128xi1>, vector<4x128xf32>
    %cst_59 = arith.constant 0.000000e+00 : f32
    %62 = vector.broadcast %cst_59 : f32 to vector<1x128xf32>
    %c0_60 = arith.constant 0 : index
    %c0_61 = arith.constant 0 : index
    %63 = vector.load %arg12[%c0_60, %c0_61] : memref<5x128xf32, #tpu.memory_space<vmem>>, vector<4x128xf32>
    tpu.vector_store %arg12[%c0_60, %c0_61], %30 {strides = array<i32>} : memref<5x128xf32, #tpu.memory_space<vmem>>, vector<4x128xf32>,
    %c4 = arith.constant 4 : index
    %c0_62 = arith.constant 0 : index
    %64 = vector.load %arg12[%c4, %c0_62] : memref<5x128xf32, #tpu.memory_space<vmem>>, vector<1x128xf32>
    tpu.vector_store %arg12[%c4, %c0_62], %62 {strides = array<i32>} : memref<5x128xf32, #tpu.memory_space<vmem>>, vector<1x128xf32>,
    %c1_63 = arith.constant 1 : index
    %c0_64 = arith.constant 0 : index
    %65 = vector.load %arg13[%c1_63, %c0_64] : memref<5x128xf32, #tpu.memory_space<vmem>>, vector<4x128xf32>
    tpu.vector_store %arg13[%c1_63, %c0_64], %61 {strides = array<i32>} : memref<5x128xf32, #tpu.memory_space<vmem>>, vector<4x128xf32>,
    %c0_65 = arith.constant 0 : index
    %c0_66 = arith.constant 0 : index
    %66 = vector.load %arg13[%c0_65, %c0_66] : memref<5x128xf32, #tpu.memory_space<vmem>>, vector<1x128xf32>
    tpu.vector_store %arg13[%c0_65, %c0_66], %62 {strides = array<i32>} : memref<5x128xf32, #tpu.memory_space<vmem>>, vector<1x128xf32>,
    %c0_67 = arith.constant 0 : index
    %c0_68 = arith.constant 0 : index
    %67 = vector.load %arg13[%c0_67, %c0_68] : memref<5x128xf32, #tpu.memory_space<vmem>>, vector<4x128xf32>
    %68 = arith.truncf %67 : vector<4x128xf32> to vector<4x128xbf16>
    %c0_69 = arith.constant 0 : index
    %c0_70 = arith.constant 0 : index
    %c0_71 = arith.constant 0 : index
    %69 = vector.load %arg7[%c0_69, %c0_70, %c0_71] : memref<4x128x128xbf16, #tpu.memory_space<vmem>>, vector<1x128x128xbf16>
    %70 = vector.shape_cast %69 : vector<1x128x128xbf16> to vector<128x128xbf16>
    %cst_72 = arith.constant dense<0.000000e+00> : vector<4x128xf32>
    %71 = tpu.matmul %68, %70, %cst_72 {dimension_numbers = #tpu.dot_dimension_numbers<[1], [0], [0], [1], [0, 0, 1, 1], [], []>} : vector<4x128xbf16>, vector<128x128xbf16>, vector<4x128xf32> -> vector<4x128xf32>
    %c0_73 = arith.constant 0 : index
    %c0_74 = arith.constant 0 : index
    %72 = vector.load %arg12[%c0_73, %c0_74] : memref<5x128xf32, #tpu.memory_space<vmem>>, vector<4x128xf32>
    %73 = arith.truncf %72 : vector<4x128xf32> to vector<4x128xbf16>
    %c1_75 = arith.constant 1 : index
    %c0_76 = arith.constant 0 : index
    %c0_77 = arith.constant 0 : index
    %74 = vector.load %arg7[%c1_75, %c0_76, %c0_77] : memref<4x128x128xbf16, #tpu.memory_space<vmem>>, vector<1x128x128xbf16>
    %75 = vector.shape_cast %74 : vector<1x128x128xbf16> to vector<128x128xbf16>
    %cst_78 = arith.constant dense<0.000000e+00> : vector<4x128xf32>
    %76 = tpu.matmul %73, %75, %cst_78 {dimension_numbers = #tpu.dot_dimension_numbers<[1], [0], [0], [1], [0, 0, 1, 1], [], []>} : vector<4x128xbf16>, vector<128x128xbf16>, vector<4x128xf32> -> vector<4x128xf32>
    %77 = arith.addf %71, %76 : vector<4x128xf32>
    %c1_79 = arith.constant 1 : index
    %c0_80 = arith.constant 0 : index
    %78 = vector.load %arg13[%c1_79, %c0_80] : memref<5x128xf32, #tpu.memory_space<vmem>>, vector<4x128xf32>
    %79 = arith.truncf %78 : vector<4x128xf32> to vector<4x128xbf16>
    %c2_81 = arith.constant 2 : index
    %c0_82 = arith.constant 0 : index
    %c0_83 = arith.constant 0 : index
    %80 = vector.load %arg7[%c2_81, %c0_82, %c0_83] : memref<4x128x128xbf16, #tpu.memory_space<vmem>>, vector<1x128x128xbf16>
    %81 = vector.shape_cast %80 : vector<1x128x128xbf16> to vector<128x128xbf16>
    %cst_84 = arith.constant dense<0.000000e+00> : vector<4x128xf32>
    %82 = tpu.matmul %79, %81, %cst_84 {dimension_numbers = #tpu.dot_dimension_numbers<[1], [0], [0], [1], [0, 0, 1, 1], [], []>} : vector<4x128xbf16>, vector<128x128xbf16>, vector<4x128xf32> -> vector<4x128xf32>
    %83 = arith.addf %77, %82 : vector<4x128xf32>
    %c1_85 = arith.constant 1 : index
    %c0_86 = arith.constant 0 : index
    %84 = vector.load %arg12[%c1_85, %c0_86] : memref<5x128xf32, #tpu.memory_space<vmem>>, vector<4x128xf32>
    %85 = arith.truncf %84 : vector<4x128xf32> to vector<4x128xbf16>
    %c3_87 = arith.constant 3 : index
    %c0_88 = arith.constant 0 : index
    %c0_89 = arith.constant 0 : index
    %86 = vector.load %arg7[%c3_87, %c0_88, %c0_89] : memref<4x128x128xbf16, #tpu.memory_space<vmem>>, vector<1x128x128xbf16>
    %87 = vector.shape_cast %86 : vector<1x128x128xbf16> to vector<128x128xbf16>
    %cst_90 = arith.constant dense<0.000000e+00> : vector<4x128xf32>
    %88 = tpu.matmul %85, %87, %cst_90 {dimension_numbers = #tpu.dot_dimension_numbers<[1], [0], [0], [1], [0, 0, 1, 1], [], []>} : vector<4x128xbf16>, vector<128x128xbf16>, vector<4x128xf32> -> vector<4x128xf32>
    %89 = arith.addf %83, %88 : vector<4x128xf32>
    %c0_91 = arith.constant 0 : index
    %c0_92 = arith.constant 0 : index
    %90 = vector.load %arg8[%c0_91, %c0_92] : memref<1x128xf32, #tpu.memory_space<vmem>>, vector<1x128xf32>
    %91 = vector.broadcast %90 : vector<1x128xf32> to vector<4x128xf32>
    %92 = arith.addf %89, %91 : vector<4x128xf32>
    %cst_93 = arith.constant 0.000000e+00 : f32
    %93 = vector.broadcast %cst_93 : f32 to vector<4x128xf32>
    %94 = arith.cmpf oge, %92, %93 : vector<4x128xf32>
    %cst_94 = arith.constant 2.000000e-01 : f32
    %95 = vector.broadcast %cst_94 : f32 to vector<4x128xf32>
    %96 = arith.mulf %95, %92 : vector<4x128xf32>
    %97 = arith.select %94, %92, %96 : vector<4x128xi1>, vector<4x128xf32>
    %98 = arith.truncf %97 : vector<4x128xf32> to vector<4x128xbf16>
    %c0_95 = arith.constant 0 : index
    %c0_96 = arith.constant 0 : index
    %99 = vector.load %arg9[%c0_95, %c0_96] : memref<128x128xbf16, #tpu.memory_space<vmem>>, vector<128x128xbf16>
    %cst_97 = arith.constant dense<0.000000e+00> : vector<4x128xf32>
    %100 = tpu.matmul %98, %99, %cst_97 {dimension_numbers = #tpu.dot_dimension_numbers<[1], [0], [0], [1], [0, 0, 1, 1], [], []>} : vector<4x128xbf16>, vector<128x128xbf16>, vector<4x128xf32> -> vector<4x128xf32>
    %c0_98 = arith.constant 0 : index
    %c0_99 = arith.constant 0 : index
    %101 = vector.load %arg10[%c0_98, %c0_99] : memref<1x128xf32, #tpu.memory_space<vmem>>, vector<1x128xf32>
    %102 = vector.broadcast %101 : vector<1x128xf32> to vector<4x128xf32>
    %103 = arith.addf %100, %102 : vector<4x128xf32>
    %c0_100 = arith.constant 0 : index
    %c0_101 = arith.constant 0 : index
    %c0_102 = arith.constant 0 : index
    %104 = vector.load %arg11[%c0_100, %c0_101, %c0_102] : memref<1x4x128xf32, #tpu.memory_space<vmem>>, vector<1x4x128xf32>
    %105 = vector.shape_cast %104 : vector<1x4x128xf32> to vector<4x128xf32>
    %106 = vector.shape_cast %103 : vector<4x128xf32> to vector<1x4x128xf32>
    tpu.vector_store %arg11[%c0_100, %c0_101, %c0_102], %106 {strides = array<i32>} : memref<1x4x128xf32, #tpu.memory_space<vmem>>, vector<1x4x128xf32>,
    return
  }
  func.func @transform_0(%arg0: i32) -> (i32, i32, i32) {
    %c0_i32 = arith.constant 0 : i32
    %c0_i32_0 = arith.constant 0 : i32
    %c0_i32_1 = arith.constant 0 : i32
    return %arg0, %c0_i32, %c0_i32_0 : i32, i32, i32
  }
  func.func @transform_1(%arg0: i32) -> (i32, i32, i32) {
    %c0_i32 = arith.constant 0 : i32
    %c0_i32_0 = arith.constant 0 : i32
    %c0_i32_1 = arith.constant 0 : i32
    return %arg0, %c0_i32, %c0_i32_0 : i32, i32, i32
  }
  func.func @transform_2(%arg0: i32) -> (i32, i32, i32) {
    %c0_i32 = arith.constant 0 : i32
    %c0_i32_0 = arith.constant 0 : i32
    %c0_i32_1 = arith.constant 0 : i32
    return %arg0, %c0_i32, %c0_i32_0 : i32, i32, i32
  }
  func.func @transform_3(%arg0: i32) -> (i32, i32, i32) {
    %c0_i32 = arith.constant 0 : i32
    %c0_i32_0 = arith.constant 0 : i32
    %c0_i32_1 = arith.constant 0 : i32
    return %arg0, %c0_i32, %c0_i32_0 : i32, i32, i32
  }
  func.func @transform_4(%arg0: i32) -> (i32, i32, i32) {
    %c0_i32 = arith.constant 0 : i32
    %c0_i32_0 = arith.constant 0 : i32
    %c0_i32_1 = arith.constant 0 : i32
    %c0_i32_2 = arith.constant 0 : i32
    return %c0_i32, %c0_i32_0, %c0_i32_1 : i32, i32, i32
  }
  func.func @transform_5(%arg0: i32) -> (i32, i32) {
    %c0_i32 = arith.constant 0 : i32
    %c0_i32_0 = arith.constant 0 : i32
    %c0_i32_1 = arith.constant 0 : i32
    return %c0_i32, %c0_i32_0 : i32, i32
  }
  func.func @transform_6(%arg0: i32) -> (i32, i32, i32) {
    %c0_i32 = arith.constant 0 : i32
    %c0_i32_0 = arith.constant 0 : i32
    %c0_i32_1 = arith.constant 0 : i32
    %c0_i32_2 = arith.constant 0 : i32
    return %c0_i32, %c0_i32_0, %c0_i32_1 : i32, i32, i32
  }
  func.func @transform_7(%arg0: i32) -> (i32, i32) {
    %c0_i32 = arith.constant 0 : i32
    %c0_i32_0 = arith.constant 0 : i32
    %c0_i32_1 = arith.constant 0 : i32
    return %c0_i32, %c0_i32_0 : i32, i32
  }
  func.func @transform_8(%arg0: i32) -> (i32, i32) {
    %c0_i32 = arith.constant 0 : i32
    %c0_i32_0 = arith.constant 0 : i32
    %c0_i32_1 = arith.constant 0 : i32
    return %c0_i32, %c0_i32_0 : i32, i32
  }
  func.func @transform_9(%arg0: i32) -> (i32, i32) {
    %c0_i32 = arith.constant 0 : i32
    %c0_i32_0 = arith.constant 0 : i32
    %c0_i32_1 = arith.constant 0 : i32
    return %c0_i32, %c0_i32_0 : i32, i32
  }
  func.func @transform_10(%arg0: i32) -> (i32, i32, i32) {
    %c0_i32 = arith.constant 0 : i32
    %c0_i32_0 = arith.constant 0 : i32
    %c0_i32_1 = arith.constant 0 : i32
    return %arg0, %c0_i32, %c0_i32_0 : i32, i32, i32
  }
}

</mosaic_0001>

<bundles_post_ra>
// kernel: move_model_forward.1
= control target key start
LH: loop header
LB: loop body
LE: loop exit
PB: predicated region body
PF: predicated region fallthrough
CT: control target
= control target key end

     0   :  { %15 = vsyncpa [#allocation5], 0  ;;  %s3104_s0 = inlined_call_operand.vmem [shape: bf16[2,5,128], index: 0, kind: input, shape index: {}]   ;;  %s3105_s1 = inlined_call_operand.vmem [shape: bf16[2,5,128], index: 1, kind: input, shape index: {}]   ;;  %s3106_s2 = inlined_call_operand.vmem [shape: bf16[2,5,128], index: 2, kind: input, shape index: {}]   ;;  %s3107_s3 = inlined_call_operand.vmem [shape: bf16[2,5,128], index: 3, kind: input, shape index: {}]   ;;  %s3108_s4 = inlined_call_operand.vmem [shape: bf16[4,128,128], index: 4, kind: input, shape index: {}]   ;;  %s3109_s5 = inlined_call_operand.vmem [shape: f32[1,128], index: 5, kind: input, shape index: {}]   ;;  %s3110_s6 = inlined_call_operand.vmem [shape: bf16[4,128,128], index: 6, kind: input, shape index: {}]   ;;  %s3111_s7 = inlined_call_operand.vmem [shape: f32[1,128], index: 7, kind: input, shape index: {}]   ;;  %s3112_s8 = inlined_call_operand.vmem [shape: bf16[128,128], index: 8, kind: input, shape index: {}]   ;;  %s3113_s9 = inlined_call_operand.vmem [shape: f32[1,128], index: 9, kind: input, shape index: {}]   ;;  %s3114_s10 = inlined_call_operand.hbm [shape: f32[2,4,128], index: 10, kind: output, shape index: {}]  }
   0x1   :  { %17 = vsyncpa [#allocation5 + $0x1], 0  ;;  %s2497_s13 = smov 0   ;;  %s2499_s14 = smov 0  }
   0x2   :  { %s2501_s15 = smov 0   ;;  %s2503_s16 = smov 0  }
   0x3 LB: > { %s2518_s17 = sadd.s32 4294967295, %s2437_s16   ;;  %s1699_s18 = sadd.s32 4294967294, %s2437_s16   ;;  %s2437_s16 = sphi %s2503_s16, %s3120_s16   ;;  %s2433_s15 = sphi %s2501_s15, %s3119_s15   ;;  %s2429_s14 = sphi %s2499_s14, %s3118_s14   ;;  %s2425_s13 = sphi %s2497_s13, %s3117_s13  }
   0x4   : > { %s2522_s19 = sadd.s32 1, %s2437_s16   ;;  %s260_s20 = sadd.s32 1, %s2433_s15 }
   0x5   : > { %s257_s21 = ssub.s32 %s2437_s16, %s2522_s19  ;;  %p270_p0 = scmp.ne.s32.totalorder %s2433_s15, %s2429_s14 }
   0x6   : > { %p258_p1 = scmp.eq.s32.totalorder %s257_s21, 0  ;;  %p271_p2 = scmp.eq.s32.totalorder %s2518_s17, 1 }
   0x7   : > { %p276_p3 = scmp.ne.s32.totalorder %s2429_s14, %s2425_s13  ;;  %p277_p4 = scmp.eq.s32.totalorder %s1699_s18, 1 }
   0x8   : > { %s2533_s22 = scalar_select %p258_p1, %s2433_s15, %s260_s20  }
   0x9   : > { %p2535_p5 = por %p271_p2, %p270_p0  ;;  %p2539_p6 = por %p277_p4, %p276_p3 }
   0xa   : > { %p1702_p7 = scmp.ge.s32.totalorder %s2437_s16, 1  ;;  %p341_p8 = scmp.lt.s32.totalorder %s2437_s16, 3 }
   0xc   : > { %p342_p9 = pnand %p1702_p7, %p341_p8 }
   0xd   : > { %p390_p10 = scmp.lt.s32.totalorder (!%p342_p9), %s2518_s17, 1 }
   0xe   : > { %345 = sbr.rel (%p342_p9) target bundleno = 803 (0x323), region = 60 }
  0x13   : > { %v2548_v0 = vld [vmem:[%s3108_s4 + $0x78] sm:$0xff]   ;;  %v2439_v1 = vmov 0.0   ;;  %v2563_v3 = vld [vmem:[%s3108_s4 + $0x70] sm:$0xff]   ;;  %vm2440_vm0 = vmmov 0   ;;  %v2582_v5 = vld [vmem:[%s3108_s4 + $0x68] sm:$0xff]   ;;  %s391_s26 = scalar_select %p390_p10, %s2518_s17, 1 }
  0x14   : > { %2002 = vmatprep.subr.bf16.mxu0 %v2439_v1  ;;  %1034 = vst [vmem:[#allocation2 + $0x4] sm:$0x1] %v2439_v1  ;;  %1036 = vst [vmem:[#allocation3] sm:$0x1] %v2439_v1  ;;  %2022 = vmatprep.subr.bf16.mxu1 %v2439_v1  ;;  %v2557_v2 = vld [vmem:[%s3108_s4 + $0x38] sm:$0xff]   ;;  %v2572_v4 = vld [vmem:[%s3108_s4 + $0x30] sm:$0xff]  }
  0x15   : > { %2003 = vmatpush3.bf16.msra.mxu0 %v2548_v0  ;;  %2018 = vmatprep.mubr.msk.bf16.mxu0 %vm2440_vm0, %v2439_v1  ;;  %v2589_v6 = vld [vmem:[%s3108_s4 + $0x28] sm:$0xff]   ;;  %v2597_v7 = vld [vmem:[%s3108_s4 + $0x60] sm:$0xff]   ;;  %s2607_s11 = sshll.u32 %s391_s26, 2  ;;  %v2613_v9 = vld [vmem:[%s3108_s4 + $0x58] sm:$0xff]  }
  0x16   : > { %2023 = vmatpush3.bf16.msra.mxu1 %v2557_v2  ;;  %2004 = vmatprep.subr.bf16.mxu0 %v2439_v1  ;;  %v2604_v8 = vld [vmem:[%s3108_s4 + $0x20] sm:$0xff]   ;;  %v2620_v10 = vld [vmem:[%s3108_s4 + $0x18] sm:$0xff]   ;;  %s2626_s27 = scalar_lea.vmem %s3105_s1, %s2607_s11  ;;  %s2633_s30 = scalar_lea.vmem %s3104_s0, %s2607_s11  ;;  %v2639_v11 = vld [vmem:[%s3108_s4 + $0x50] sm:$0xff]  }
  0x17   : > { %2024 = vmatprep.subr.bf16.mxu1 %v2439_v1  ;;  %2038 = vmatprep.mubr.msk.bf16.mxu1 %vm2440_vm0, %v2439_v1  ;;  %v2646_v12 = vld [vmem:[%s3108_s4 + $0x10] sm:$0xff]   ;;  %v2653_v13 = vld [vmem:[%s3108_s4 + $0x48] sm:$0xff]   ;;  %v2667_v15 = vld [vmem:[%s3108_s4 + $0x40] sm:$0xff]   ;;  %s401_s28 = scalar_lea.vmem %s3106_s2, %s2607_s11  ;;  %s405_s18 = scalar_lea.vmem %s3107_s3, %s2607_s11 }
  0x18   : > { %v2660_v14 = vld [vmem:[%s3108_s4 + $0x8] sm:$0xff]   ;;  %v2674_v16 = vld [vmem:[%s3108_s4] sm:$0xff]   ;;  %v2683_v19 = vld [vmem:[%s3108_s4 + $0xb8] sm:$0xff]   ;;  %s1882_s11 = sshll.u32 %s2518_s17, 6  ;;  %s2441_s17 = smov [#allocation4]  }
  0x19   : > { %2005 = vmatpush3.bf16.msra.mxu0 %v2563_v3  ;;  %v424_v17 = vld [vmem:[%s2626_s27] sm:$0x3]  ;;  %v2690_v20 = vld [vmem:[%s3108_s4 + $0xf8] sm:$0xff]   ;;  %v2697_v21 = vld [vmem:[%s3108_s4 + $0xb0] sm:$0xff]   ;;  %s3063_s25 = scalar_lea.hbm %s3114_s10, %s1882_s11 }
  0x1a   : > { %2025 = vmatpush3.bf16.msra.mxu1 %v2572_v4  ;;  %2006 = vmatprep.subr.bf16.mxu0 %v2439_v1  ;;  %v407_v18 = vld [vmem:[%s2633_s30] sm:$0x3]  ;;  %v2704_v22 = vld [vmem:[%s3108_s4 + $0xf0] sm:$0xff]   ;;  %v2710_v23 = vld [vmem:[%s3108_s4 + $0xa8] sm:$0xff]  }
  0x1b   : > { %2026 = vmatprep.subr.bf16.mxu1 %v2439_v1  ;;  %v2717_v24 = vld [vmem:[%s3108_s4 + $0xe8] sm:$0xff]   ;;  %v2728_v25 = vld [vmem:[%s3108_s4 + $0xa0] sm:$0xff]   ;;  %v2742_v27 = vld [vmem:[%s3108_s4 + $0x98] sm:$0xff]  }
  0x1c   : > { %v2733_v26 = vld [vmem:[%s3108_s4 + $0xe0] sm:$0xff]   ;;  %v2747_v28 = vld [vmem:[%s3108_s4 + $0xd8] sm:$0xff]   ;;  %v2756_v29 = vld [vmem:[%s3108_s4 + $0x90] sm:$0xff]  }
  0x1d   : > { %2007 = vmatpush3.bf16.msra.mxu0 %v2582_v5  ;;  %v2761_v30 = vld [vmem:[%s3108_s4 + $0xd0] sm:$0xff]   ;;  %v2770_v31 = vld [vmem:[%s3108_s4 + $0x88] sm:$0xff]   ;;  %v2784_v33 = vld [vmem:[%s3108_s4 + $0x80] sm:$0xff]  }
  0x1e   : > { %2027 = vmatpush3.bf16.msra.mxu1 %v2589_v6  ;;  %2008 = vmatprep.subr.bf16.mxu0 %v2439_v1  ;;  %v2775_v32 = vld [vmem:[%s3108_s4 + $0xc8] sm:$0xff]   ;;  %v2789_v34 = vld [vmem:[%s3108_s4 + $0xc0] sm:$0xff]   ;;  %v2337_v47 = vld [vmem:[%s3110_s6 + $0x78] sm:$0xff]  }
  0x1f   : > { %2028 = vmatprep.subr.bf16.mxu1 %v2439_v1  ;;  %v618_v35 = vld [vmem:[%s401_s28] sm:$0x3]  ;;  %v2338_v48 = vld [vmem:[%s3110_s6 + $0x70] sm:$0xff]   ;;  %v2339_v49 = vld [vmem:[%s3110_s6 + $0x68] sm:$0xff]   ;;  %s387_s28 = sand.u32 1, %s2429_s14  }
  0x20   : > { %v725_v36 = vld [vmem:[%s405_s18] sm:$0x3]  ;;  %v2341_v51 = vld [vmem:[%s3110_s6 + $0x58] sm:$0xff]   ;;  %v2342_v52 = vld [vmem:[%s3110_s6 + $0x50] sm:$0xff]   ;;  %s1703_s29 = sshll.u32 %s387_s28, 2  ;;  %s1591_s26 = scalar_lea.sflag [#allocation5], %s387_s28 }
  0x21   : > { %2009 = vmatpush3.bf16.msra.mxu0 %v2597_v7  ;;  %v2320_v37 = vld [vmem:[%s2633_s30] ss:$0 sps:$4 sm:$0x77]   ;;  %v2343_v53 = vld [vmem:[%s3110_s6 + $0x48] sm:$0xff]   ;;  %v2345_v55 = vld [vmem:[%s3110_s6 + $0x38] sm:$0xff]  }
  0x22   : > { %2029 = vmatpush3.bf16.msra.mxu1 %v2604_v8  ;;  %2010 = vmatprep.subr.bf16.mxu0 %v2439_v1  ;;  %v2319_v38 = vld [vmem:[%s2626_s27] ss:$0 sps:$4 sm:$0x77]   ;;  %v930_v39 = vshll.u32 %v2320_v37, 16  ;;  %v928_v41 = vshrl.u32 %v2320_v37, 16  ;;  %v2347_v56 = vld [vmem:[%s3110_s6 + $0x30] sm:$0xff]  }
  0x23   : > { %2030 = vmatprep.subr.bf16.mxu1 %v2439_v1  ;;  %v983_v40 = vshll.u32 %v2319_v38, 16  ;;  %v981_v43 = vshrl.u32 %v2319_v38, 16  ;;  %v2340_v50 = vld [vmem:[%s3110_s6 + $0x60] sm:$0xff]   ;;  %v2349_v57 = vld [vmem:[%s3110_s6 + $0x28] sm:$0xff]   ;;  %v2353_v59 = vld [vmem:[%s3110_s6 + $0x18] sm:$0xff]   ;;  %s389_s27 = scalar_lea.vmem [#allocation4], %s1703_s29 }
  0x24   : > { %v932_v42 = vrot.slane %v930_v39, 1  ;;  %v2344_v54 = vld [vmem:[%s3110_s6 + $0x40] sm:$0xff]   ;;  %v2355_v60 = vld [vmem:[%s3110_s6 + $0x10] sm:$0xff]   ;;  %v2357_v61 = vld [vmem:[%s3110_s6 + $0x8] sm:$0xff]   ;;  %s1604_s30 = sshll.u32 %s389_s27, 4  ;;  %s2381_s29 = sshll.u32 %s2441_s17, 4  ;;  %s3065_s30 = int_to_ptr.vmem [resolvable:$true] %s1604_s30  ;;  %s2382_s29 = int_to_ptr.vmem [resolvable:$false] %s2381_s29 }
  0x25   : > { %2011 = vmatpush3.bf16.msra.mxu0 %v2613_v9  ;;  %v985_v44 = vrot.slane %v983_v40, 1  ;;  %v2351_v58 = vld [vmem:[%s3110_s6 + $0x20] sm:$0xff]   ;;  %v2358_v39 = vld [vmem:[%s3110_s6 + $0x88] sm:$0xff]   ;;  %s2377_s12 = scalar_lea.vmem %s3065_s30, 64  ;;  %s2383_s18 = scalar_lea.vmem %s2382_s29, 128 }
  0x26   : > { %2031 = vmatpush3.bf16.msra.mxu1 %v2620_v10  ;;  %2012 = vmatprep.subr.bf16.mxu0 %v2439_v1  ;;  %v933_v45 = vor.u32 %v932_v42, %v928_v41  ;;  %v2359_v62 = vld [vmem:[%s3110_s6] sm:$0xff]   ;;  %p2378_p11 = scmp.ne.s32.totalorder %s3065_s30, %s2377_s12  ;;  %p2384_p0 = scmp.lt.s32.totalorder %s3065_s30, %s2382_s29 }
  0x27   : > { %2032 = vmatprep.subr.bf16.mxu1 %v2439_v1  ;;  %v986_v46 = vor.u32 %v985_v44, %v981_v43  ;;  %v2360_v40 = vld [vmem:[%s3110_s6 + $0x80] sm:$0xff]   ;;  %p2385_p1 = scmp.lt.s32.totalorder %s2383_s18, %s2377_s12 }
  0x28   : > { %p2379_p12 = pnand %p2378_p11, %p2535_p5 }
  0x29   : > { %2013 = vmatpush3.bf16.msra.mxu0 %v2639_v11  ;;  %p2386_p2 = por %p2385_p1, %p2384_p0 }
  0x2a   : > { %2033 = vmatpush3.bf16.msra.mxu1 %v2646_v12  ;;  %2014 = vmatprep.subr.bf16.mxu0 %v2439_v1  ;;  %p2380_p13 = pneg %p2379_p12 }
  0x2b   : > { %2034 = vmatprep.subr.bf16.mxu1 %v2439_v1 }
  0x2c   : > { %p2387_p3 = pnand %p2386_p2, %p2380_p13 }
  0x2d   : > { %2015 = vmatpush3.bf16.msra.mxu0 %v2653_v13 }
  0x2e   : > { %2035 = vmatpush3.bf16.msra.mxu1 %v2660_v14  ;;  %2016 = vmatprep.subr.bf16.mxu0 %v2439_v1 }
  0x2f   : > { %2036 = vmatprep.subr.bf16.mxu1 %v2439_v1 }
  0x31   : > { %2017 = vmatpush3.bf16.msra.mxu0 %v2667_v15 }
  0x32   : > { %2037 = vmatpush3.bf16.msra.mxu1 %v2674_v16  ;;  %2042 = vmatprep.subr.bf16.mxu0 %v2439_v1 }
  0x33   : > { %2062 = vmatprep.subr.bf16.mxu1 %v2439_v1 }
  0x34   : > { %2019 = vmatmul.mubr.bf16.vlgmr.msra.gmra.mxu0 %v424_v17 }
  0x35   : > { %2039 = vmatmul.mubr.bf16.vlgmr.msra.gmra.mxu1 %v407_v18  ;;  %2043 = vmatpush3.bf16.msra.mxu0 %v2683_v19 }
  0x36   : > { %2063 = vmatpush3.bf16.msra.mxu1 %v2690_v20  ;;  %2044 = vmatprep.subr.bf16.mxu0 %v2439_v1 }
  0x37   : > { %2064 = vmatprep.subr.bf16.mxu1 %v2439_v1  ;;  %2058 = vmatprep.mubr.msk.bf16.mxu0 %vm2440_vm0, %v2439_v1 }
  0x38   : > { %2078 = vmatprep.mubr.msk.bf16.mxu1 %vm2440_vm0, %v2439_v1 }
  0x39   : > { %2045 = vmatpush3.bf16.msra.mxu0 %v2697_v21 }
  0x3a   : > { %2065 = vmatpush3.bf16.msra.mxu1 %v2704_v22  ;;  %2046 = vmatprep.subr.bf16.mxu0 %v2439_v1 }
  0x3b   : > { %2066 = vmatprep.subr.bf16.mxu1 %v2439_v1 }
  0x3d   : > { %2047 = vmatpush3.bf16.msra.mxu0 %v2710_v23 }
  0x3e   : > { %2067 = vmatpush3.bf16.msra.mxu1 %v2717_v24  ;;  %2048 = vmatprep.subr.bf16.mxu0 %v2439_v1 }
  0x3f   : > { %2068 = vmatprep.subr.bf16.mxu1 %v2439_v1 }
  0x41   : > { %2049 = vmatpush3.bf16.msra.mxu0 %v2728_v25 }
  0x42   : > { %2069 = vmatpush3.bf16.msra.mxu1 %v2733_v26  ;;  %2050 = vmatprep.subr.bf16.mxu0 %v2439_v1 }
  0x43   : > { %2070 = vmatprep.subr.bf16.mxu1 %v2439_v1 }
  0x45   : > { %2051 = vmatpush3.bf16.msra.mxu0 %v2742_v27 }
  0x46   : > { %2071 = vmatpush3.bf16.msra.mxu1 %v2747_v28  ;;  %2052 = vmatprep.subr.bf16.mxu0 %v2439_v1 }
  0x47   : > { %2072 = vmatprep.subr.bf16.mxu1 %v2439_v1 }
  0x49   : > { %2053 = vmatpush3.bf16.msra.mxu0 %v2756_v29 }
  0x4a   : > { %2073 = vmatpush3.bf16.msra.mxu1 %v2761_v30  ;;  %2054 = vmatprep.subr.bf16.mxu0 %v2439_v1 }
  0x4b   : > { %2074 = vmatprep.subr.bf16.mxu1 %v2439_v1 }
  0x4d   : > { %2055 = vmatpush3.bf16.msra.mxu0 %v2770_v31 }
  0x4e   : > { %2075 = vmatpush3.bf16.msra.mxu1 %v2775_v32  ;;  %2056 = vmatprep.subr.bf16.mxu0 %v2439_v1 }
  0x4f   : > { %2076 = vmatprep.subr.bf16.mxu1 %v2439_v1 }
  0x51   : > { %2057 = vmatpush3.bf16.msra.mxu0 %v2784_v33 }
  0x52   : > { %2077 = vmatpush3.bf16.msra.mxu1 %v2789_v34  ;;  %2082 = vmatprep.subr.bf16.mxu0 %v2439_v1 }
  0x53   : > { %2102 = vmatprep.subr.bf16.mxu1 %v2439_v1 }
  0x54   : > { %2059 = vmatmul.mubr.bf16.vlgmr.msra.gmra.mxu0 %v618_v35 }
  0x55   : > { %2079 = vmatmul.mubr.bf16.vlgmr.msra.gmra.mxu1 %v725_v36  ;;  %2083 = vmatpush3.bf16.msra.mxu0 %v2548_v0 }
  0x56   : > { %2103 = vmatpush3.bf16.msra.mxu1 %v2557_v2  ;;  %2084 = vmatprep.subr.bf16.mxu0 %v2439_v1 }
  0x57   : > { %2104 = vmatprep.subr.bf16.mxu1 %v2439_v1  ;;  %2098 = vmatprep.mubr.msk.bf16.mxu0 %vm2440_vm0, %v2439_v1 }
  0x58   : > { %2118 = vmatprep.mubr.msk.bf16.mxu1 %vm2440_vm0, %v2439_v1 }
  0x59   : > { %2085 = vmatpush3.bf16.msra.mxu0 %v2563_v3 }
  0x5a   : > { %2105 = vmatpush3.bf16.msra.mxu1 %v2572_v4  ;;  %2086 = vmatprep.subr.bf16.mxu0 %v2439_v1 }
  0x5b   : > { %2106 = vmatprep.subr.bf16.mxu1 %v2439_v1 }
  0x5d   : > { %2087 = vmatpush3.bf16.msra.mxu0 %v2582_v5 }
  0x5e   : > { %2107 = vmatpush3.bf16.msra.mxu1 %v2589_v6  ;;  %2088 = vmatprep.subr.bf16.mxu0 %v2439_v1 }
  0x5f   : > { %2108 = vmatprep.subr.bf16.mxu1 %v2439_v1 }
  0x61   : > { %2089 = vmatpush3.bf16.msra.mxu0 %v2597_v7 }
  0x62   : > { %2109 = vmatpush3.bf16.msra.mxu1 %v2604_v8  ;;  %2090 = vmatprep.subr.bf16.mxu0 %v2439_v1 }
  0x63   : > { %2110 = vmatprep.subr.bf16.mxu1 %v2439_v1 }
  0x65   : > { %2091 = vmatpush3.bf16.msra.mxu0 %v2613_v9 }
  0x66   : > { %2111 = vmatpush3.bf16.msra.mxu1 %v2620_v10  ;;  %2092 = vmatprep.subr.bf16.mxu0 %v2439_v1 }
  0x67   : > { %2112 = vmatprep.subr.bf16.mxu1 %v2439_v1 }
  0x69   : > { %2093 = vmatpush3.bf16.msra.mxu0 %v2639_v11 }
  0x6a   : > { %2113 = vmatpush3.bf16.msra.mxu1 %v2646_v12  ;;  %2094 = vmatprep.subr.bf16.mxu0 %v2439_v1  ;;  %v1788_v12 = vld [vmem:[%s3109_s5] ss:$0 sm:$0xff] }
  0x6b   : > { %2114 = vmatprep.subr.bf16.mxu1 %v2439_v1 }
  0x6d   : > { %2095 = vmatpush3.bf16.msra.mxu0 %v2653_v13 }
  0x6e   : > { %2115 = vmatpush3.bf16.msra.mxu1 %v2660_v14  ;;  %2096 = vmatprep.subr.bf16.mxu0 %v2439_v1 }
  0x6f   : > { %2116 = vmatprep.subr.bf16.mxu1 %v2439_v1 }
  0x71   : > { %2097 = vmatpush3.bf16.msra.mxu0 %v2667_v15 }
  0x72   : > { %2117 = vmatpush3.bf16.msra.mxu1 %v2674_v16  ;;  %2122 = vmatprep.subr.bf16.mxu0 %v2439_v1 }
  0x73   : > { %2142 = vmatprep.subr.bf16.mxu1 %v2439_v1 }
  0x74   : > { %2099 = vmatmul.mubr.bf16.vlgmr.msra.gmra.mxu0 %v725_v36  ;;  %v2356_v36 = vld [vmem:[%s3110_s6 + $0x90] sm:$0xff]  }
  0x75   : > { %2119 = vmatmul.mubr.bf16.vlgmr.msra.gmra.mxu1 %v618_v35  ;;  %2123 = vmatpush3.bf16.msra.mxu0 %v2683_v19 }
  0x76   : > { %2143 = vmatpush3.bf16.msra.mxu1 %v2690_v20  ;;  %2124 = vmatprep.subr.bf16.mxu0 %v2439_v1 }
  0x77   : > { %2144 = vmatprep.subr.bf16.mxu1 %v2439_v1  ;;  %2138 = vmatprep.mubr.msk.bf16.mxu0 %vm2440_vm0, %v2439_v1 }
  0x78   : > { %2158 = vmatprep.mubr.msk.bf16.mxu1 %vm2440_vm0, %v2439_v1 }
  0x79   : > { %2125 = vmatpush3.bf16.msra.mxu0 %v2697_v21 }
  0x7a   : > { %2145 = vmatpush3.bf16.msra.mxu1 %v2704_v22  ;;  %2126 = vmatprep.subr.bf16.mxu0 %v2439_v1 }
  0x7b   : > { %2146 = vmatprep.subr.bf16.mxu1 %v2439_v1 }
  0x7d   : > { %2127 = vmatpush3.bf16.msra.mxu0 %v2710_v23 }
  0x7e   : > { %2147 = vmatpush3.bf16.msra.mxu1 %v2717_v24  ;;  %2128 = vmatprep.subr.bf16.mxu0 %v2439_v1  ;;  %v2346_v24 = vld [vmem:[%s3110_s6 + $0xb8] sm:$0xff]  }
  0x7f   : > { %2148 = vmatprep.subr.bf16.mxu1 %v2439_v1 }
  0x81   : > { %2129 = vmatpush3.bf16.msra.mxu0 %v2728_v25 }
  0x82   : > { %2149 = vmatpush3.bf16.msra.mxu1 %v2733_v26  ;;  %2130 = vmatprep.subr.bf16.mxu0 %v2439_v1  ;;  %v2348_v26 = vld [vmem:[%s3110_s6 + $0xb0] sm:$0xff]  }
  0x83   : > { %2150 = vmatprep.subr.bf16.mxu1 %v2439_v1 }
  0x85   : > { %2131 = vmatpush3.bf16.msra.mxu0 %v2742_v27  ;;  %v2350_v27 = vld [vmem:[%s3110_s6 + $0xa8] sm:$0xff]  }
  0x86   : > { %2151 = vmatpush3.bf16.msra.mxu1 %v2747_v28  ;;  %2132 = vmatprep.subr.bf16.mxu0 %v2439_v1  ;;  %v2352_v28 = vld [vmem:[%s3110_s6 + $0xa0] sm:$0xff]  }
  0x87   : > { %2152 = vmatprep.subr.bf16.mxu1 %v2439_v1 }
  0x89   : > { %2133 = vmatpush3.bf16.msra.mxu0 %v2756_v29 }
  0x8a   : > { %2153 = vmatpush3.bf16.msra.mxu1 %v2761_v30  ;;  %2134 = vmatprep.subr.bf16.mxu0 %v2439_v1 }
  0x8b   : > { %2154 = vmatprep.subr.bf16.mxu1 %v2439_v1 }
  0x8d   : > { %2135 = vmatpush3.bf16.msra.mxu0 %v2770_v31  ;;  %v2354_v31 = vld [vmem:[%s3110_s6 + $0x98] sm:$0xff]  }
  0x8e   : > { %2155 = vmatpush3.bf16.msra.mxu1 %v2775_v32  ;;  %2136 = vmatprep.subr.bf16.mxu0 %v2439_v1 }
  0x8f   : > { %2156 = vmatprep.subr.bf16.mxu1 %v2439_v1 }
  0x91   : > { %2137 = vmatpush3.bf16.msra.mxu0 %v2784_v33 }
  0x92   : > { %2157 = vmatpush3.bf16.msra.mxu1 %v2789_v34  ;;  %2162 = vmatprep.subr.bf16.mxu0 %v2439_v1 }
  0x93   : > { %2182 = vmatprep.subr.bf16.mxu1 %v2439_v1 }
  0x94   : > { %2139 = vmatmul.mubr.bf16.vlgmr.msra.gmra.mxu0 %v933_v45 }
  0x95   : > { %2159 = vmatmul.mubr.bf16.vlgmr.msra.gmra.mxu1 %v986_v46  ;;  %2163 = vmatpush3.bf16.msra.mxu0 %v2337_v47 }
  0x96   : > { %2164 = vmatprep.subr.bf16.mxu0 %v2439_v1  ;;  %2178 = vmatprep.mubr.msk.bf16.mxu0 %vm2440_vm0, %v2439_v1 }
  0x97   : > { %2198 = vmatprep.mubr.msk.bf16.mxu1 %vm2440_vm0, %v2439_v1  ;;  %2183 = vmatpush3.bf16.msra.mxu1 %v2345_v55 }
  0x98   : > { %2184 = vmatprep.subr.bf16.mxu1 %v2439_v1 }
  0x99   : > { %2165 = vmatpush3.bf16.msra.mxu0 %v2338_v48 }
  0x9a   : > { %2166 = vmatprep.subr.bf16.mxu0 %v2439_v1 }
  0x9b   : > { %2185 = vmatpush3.bf16.msra.mxu1 %v2347_v56 }
  0x9c   : > { %2186 = vmatprep.subr.bf16.mxu1 %v2439_v1 }
  0x9d   : > { %2167 = vmatpush3.bf16.msra.mxu0 %v2339_v49 }
  0x9e   : > { %2168 = vmatprep.subr.bf16.mxu0 %v2439_v1 }
  0x9f   : > { %2187 = vmatpush3.bf16.msra.mxu1 %v2349_v57  ;;  %v2361_v57 = vld [vmem:[%s3110_s6 + $0xf8] sm:$0xff]  }
  0xa0   : > { %2188 = vmatprep.subr.bf16.mxu1 %v2439_v1 }
  0xa1   : > { %2169 = vmatpush3.bf16.msra.mxu0 %v2340_v50 }
  0xa2   : > { %2170 = vmatprep.subr.bf16.mxu0 %v2439_v1 }
  0xa3   : > { %2189 = vmatpush3.bf16.msra.mxu1 %v2351_v58 }
  0xa4   : > { %2190 = vmatprep.subr.bf16.mxu1 %v2439_v1 }
  0xa5   : > { %2171 = vmatpush3.bf16.msra.mxu0 %v2341_v51 }
  0xa6   : > { %2172 = vmatprep.subr.bf16.mxu0 %v2439_v1 }
  0xa7   : > { %2191 = vmatpush3.bf16.msra.mxu1 %v2353_v59 }
  0xa8   : > { %2192 = vmatprep.subr.bf16.mxu1 %v2439_v1 }
  0xa9   : > { %2173 = vmatpush3.bf16.msra.mxu0 %v2342_v52 }
  0xaa   : > { %2174 = vmatprep.subr.bf16.mxu0 %v2439_v1 }
  0xab   : > { %2193 = vmatpush3.bf16.msra.mxu1 %v2355_v60  ;;  %v2362_v60 = vld [vmem:[%s3110_s6 + $0xf0] sm:$0xff]  }
  0xac   : > { %2194 = vmatprep.subr.bf16.mxu1 %v2439_v1 }
  0xad   : > { %2175 = vmatpush3.bf16.msra.mxu0 %v2343_v53 }
  0xae   : > { %2176 = vmatprep.subr.bf16.mxu0 %v2439_v1 }
  0xaf   : > { %2195 = vmatpush3.bf16.msra.mxu1 %v2357_v61  ;;  %v2363_v61 = vld [vmem:[%s3110_s6 + $0xe8] sm:$0xff]  }
  0xb0   : > { %2196 = vmatprep.subr.bf16.mxu1 %v2439_v1 }
  0xb1   : > { %2177 = vmatpush3.bf16.msra.mxu0 %v2344_v54 }
  0xb2   : > { %2202 = vmatprep.subr.bf16.mxu0 %v2439_v1 }
  0xb3   : > { %2197 = vmatpush3.bf16.msra.mxu1 %v2359_v62  ;;  %v2364_v62 = vld [vmem:[%s3110_s6 + $0xe0] sm:$0xff]  }
  0xb4   : > { %2222 = vmatprep.subr.bf16.mxu1 %v2439_v1 }
  0xf4   : > { %v524_v63 = vpop.f32.mrf.mxu0 }
  0xf5   : > { %v612_v0 = vpop.f32.mrf.mxu1 }
  0xf6   : > { %v2020_v2 = vpop.f32.mrf.mxu0  ;;  %v613_v8 = vadd.f32 %v612_v0, %v524_v63  ;;  %v2365_v63 = vld [vmem:[%s3110_s6 + $0xd8] sm:$0xff]   ;;  %v2366_v0 = vld [vmem:[%s3110_s6 + $0xd0] sm:$0xff]  }
  0xf7   : > { %v2040_v3 = vpop.f32.mrf.mxu1  ;;  %v2367_v2 = vld [vmem:[%s3110_s6 + $0xc8] sm:$0xff]  }
  0xf8   : > { %v527_v4 = vpop.f32.mrf.mxu0  ;;  %v2368_v3 = vld [vmem:[%s3110_s6 + $0xc0] sm:$0xff]  }
  0xf9   : > { %v615_v5 = vpop.f32.mrf.mxu1 }
  0xfa   : > { %v2021_v6 = vpop.f32.mrf.mxu0 }
  0xfb   : > { %v2041_v7 = vpop.f32.mrf.mxu1  ;;  %v2369_v6 = vld [vmem:[%s3112_s8 + $0x38] sm:$0xff]  }
  0xfc   : > { %v2370_v7 = vld [vmem:[%s3112_s8 + $0x30] sm:$0xff]  }
 0x114   : > { %v718_v9 = vpop.f32.mrf.mxu0 }
 0x115   : > { %v724_v10 = vadd.f32 %v718_v9, %v613_v8  ;;  %v825_v11 = vpop.f32.mrf.mxu1  ;;  %v2371_v8 = vld [vmem:[%s3112_s8 + $0x28] sm:$0xff]   ;;  %v2372_v9 = vld [vmem:[%s3112_s8 + $0x20] sm:$0xff]  }
 0x116   : > { %v2060_v13 = vpop.f32.mrf.mxu0 }
 0x117   : > { %v831_v14 = vadd.f32 %v825_v11, %v724_v10  ;;  %v2080_v15 = vpop.f32.mrf.mxu1  ;;  %v2373_v10 = vld [vmem:[%s3112_s8 + $0x18] sm:$0xff]   ;;  %v2374_v11 = vld [vmem:[%s3112_s8 + $0x10] sm:$0xff]   ;;  %v2376_v13 = vld [vmem:[%s3112_s8] sm:$0xff]  }
 0x118   : > { %v721_v16 = vpop.f32.mrf.mxu0 }
 0x119   : > { %v839_v17 = vadd.f32 %v1788_v12, %v831_v14  ;;  %v828_v18 = vpop.f32.mrf.mxu1 }
 0x11a   : > { %v2061_v19 = vpop.f32.mrf.mxu0 }
 0x11b   : > { %vm840_vm1 = vcmp.ge.f32.partialorder %v839_v17, 0.0  ;;  %v841_v20 = vmul.f32 0.2, %v839_v17  ;;  %v2081_v21 = vpop.f32.mrf.mxu1 }
 0x11d   : > { %v842_v22 = vsel %vm840_vm1, %v839_v17, %v841_v20 }
 0x11e   : > { %1033 = vst [vmem:[#allocation2] sm:$0xf] %v842_v22 }
 0x125   : > { %v1055_v23 = vld [vmem:[#allocation2] sm:$0xf] }
 0x126   : > { %v1056_v25 = vpack.c.bf16 %v1055_v23, %v1055_v23  ;;  %v1358_v4 = vld [vmem:[#allocation2 + $0x1] sm:$0xf] }
 0x127   : > { %v1359_v5 = vpack.c.bf16 %v1358_v4, %v1358_v4 }
 0x128   : > { %2179 = vmatmul.mubr.bf16.vlgmr.msra.gmra.mxu0 %v1056_v25 }
 0x129   : > { %2203 = vmatpush3.bf16.msra.mxu0 %v2346_v24  ;;  %2218 = vmatprep.mubr.msk.bf16.mxu0 %vm2440_vm0, %v2439_v1 }
 0x12a   : > { %2204 = vmatprep.subr.bf16.mxu0 %v2439_v1 }
 0x12d   : > { %2205 = vmatpush3.bf16.msra.mxu0 %v2348_v26 }
 0x12e   : > { %2206 = vmatprep.subr.bf16.mxu0 %v2439_v1 }
 0x131   : > { %2207 = vmatpush3.bf16.msra.mxu0 %v2350_v27 }
 0x132   : > { %2208 = vmatprep.subr.bf16.mxu0 %v2439_v1 }
 0x134   : > { %v877_v29 = vpop.f32.mrf.mxu0 }
 0x135   : > { %v917_v30 = vpop.f32.mrf.mxu1  ;;  %2209 = vmatpush3.bf16.msra.mxu0 %v2352_v28  ;;  %v1871_v28 = vld [vmem:[%s3111_s7] ss:$0 sm:$0xff] }
 0x136   : > { %v2100_v32 = vpop.f32.mrf.mxu0  ;;  %2210 = vmatprep.subr.bf16.mxu0 %v2439_v1  ;;  %v918_v41 = vadd.f32 %v917_v30, %v877_v29 }
 0x137   : > { %v2120_v33 = vpop.f32.mrf.mxu1 }
 0x138   : > { %v880_v34 = vpop.f32.mrf.mxu0 }
 0x139   : > { %v920_v35 = vpop.f32.mrf.mxu1  ;;  %2211 = vmatpush3.bf16.msra.mxu0 %v2354_v31 }
 0x13a   : > { %v2101_v37 = vpop.f32.mrf.mxu0  ;;  %2212 = vmatprep.subr.bf16.mxu0 %v2439_v1 }
 0x13b   : > { %v2121_v38 = vpop.f32.mrf.mxu1  ;;  %v1872_v37 = vld [vmem:[%s3113_s9] ss:$0 sm:$0xff] }
 0x13d   : > { %2213 = vmatpush3.bf16.msra.mxu0 %v2356_v36 }
 0x13e   : > { %2214 = vmatprep.subr.bf16.mxu0 %v2439_v1 }
 0x141   : > { %2215 = vmatpush3.bf16.msra.mxu0 %v2358_v39 }
 0x142   : > { %2216 = vmatprep.subr.bf16.mxu0 %v2439_v1 }
 0x145   : > { %2217 = vmatpush3.bf16.msra.mxu0 %v2360_v40 }
 0x146   : > { %2242 = vmatprep.subr.bf16.mxu0 %v2439_v1 }
 0x154   : > { %v969_v42 = vpop.f32.mrf.mxu0 }
 0x155   : > { %v975_v43 = vadd.f32 %v969_v42, %v918_v41  ;;  %v1022_v44 = vpop.f32.mrf.mxu1 }
 0x156   : > { %v2140_v45 = vpop.f32.mrf.mxu0 }
 0x157   : > { %v1028_v46 = vadd.f32 %v1022_v44, %v975_v43  ;;  %v2160_v47 = vpop.f32.mrf.mxu1 }
 0x158   : > { %v972_v48 = vpop.f32.mrf.mxu0 }
 0x159   : > { %v1029_v49 = vadd.f32 %v1788_v12, %v1028_v46  ;;  %v1025_v50 = vpop.f32.mrf.mxu1  ;;  %v2375_v12 = vld [vmem:[%s3112_s8 + $0x8] sm:$0xff]  }
 0x15a   : > { %v2141_v51 = vpop.f32.mrf.mxu0 }
 0x15b   : > { %vm1030_vm2 = vcmp.ge.f32.partialorder %v1029_v49, 0.0  ;;  %v1031_v52 = vmul.f32 0.2, %v1029_v49  ;;  %v2161_v53 = vpop.f32.mrf.mxu1 }
 0x15d   : > { %v1032_v54 = vsel %vm1030_vm2, %v1029_v49, %v1031_v52 }
 0x15e   : > { %1035 = vst [vmem:[#allocation3 + $0x1] sm:$0xf] %v1032_v54 }
 0x165   : > { %v1037_v55 = vld [vmem:[#allocation3] sm:$0xf] }
 0x166   : > { %v1250_v56 = vld [vmem:[#allocation3 + $0x1] sm:$0xf]  ;;  %v1038_v58 = vpack.c.bf16 %v1037_v55, %v1037_v55 }
 0x167   : > { %v1251_v59 = vpack.c.bf16 %v1250_v56, %v1250_v56 }
 0x168   : > { %2199 = vmatmul.mubr.bf16.vlgmr.msra.gmra.mxu1 %v1038_v58 }
 0x169   : > { %2219 = vmatmul.mubr.bf16.vlgmr.msra.gmra.mxu0 %v1251_v59  ;;  %2223 = vmatpush3.bf16.msra.mxu1 %v2361_v57 }
 0x16a   : > { %2238 = vmatprep.mubr.msk.bf16.mxu1 %vm2440_vm0, %v2439_v1  ;;  %2224 = vmatprep.subr.bf16.mxu1 %v2439_v1 }
 0x16b   : > { %2258 = vmatprep.mubr.msk.bf16.mxu0 %vm2440_vm0, %v2439_v1  ;;  %2243 = vmatpush3.bf16.msra.mxu0 %v2369_v6 }
 0x16c   : > { %2244 = vmatprep.subr.bf16.mxu0 %v2439_v1 }
 0x16d   : > { %2225 = vmatpush3.bf16.msra.mxu1 %v2362_v60 }
 0x16e   : > { %2226 = vmatprep.subr.bf16.mxu1 %v2439_v1 }
 0x16f   : > { %2245 = vmatpush3.bf16.msra.mxu0 %v2370_v7 }
 0x170   : > { %2246 = vmatprep.subr.bf16.mxu0 %v2439_v1 }
 0x171   : > { %2227 = vmatpush3.bf16.msra.mxu1 %v2363_v61 }
 0x172   : > { %2228 = vmatprep.subr.bf16.mxu1 %v2439_v1 }
 0x173   : > { %2247 = vmatpush3.bf16.msra.mxu0 %v2371_v8 }
 0x174   : > { %2248 = vmatprep.subr.bf16.mxu0 %v2439_v1 }
 0x175   : > { %2229 = vmatpush3.bf16.msra.mxu1 %v2364_v62 }
 0x176   : > { %2230 = vmatprep.subr.bf16.mxu1 %v2439_v1 }
 0x177   : > { %2249 = vmatpush3.bf16.msra.mxu0 %v2372_v9 }
 0x178   : > { %2250 = vmatprep.subr.bf16.mxu0 %v2439_v1 }
 0x179   : > { %2231 = vmatpush3.bf16.msra.mxu1 %v2365_v63 }
 0x17a   : > { %2232 = vmatprep.subr.bf16.mxu1 %v2439_v1 }
 0x17b   : > { %2251 = vmatpush3.bf16.msra.mxu0 %v2373_v10 }
 0x17c   : > { %2252 = vmatprep.subr.bf16.mxu0 %v2439_v1 }
 0x17d   : > { %2233 = vmatpush3.bf16.msra.mxu1 %v2366_v0 }
 0x17e   : > { %2234 = vmatprep.subr.bf16.mxu1 %v2439_v1 }
 0x17f   : > { %2253 = vmatpush3.bf16.msra.mxu0 %v2374_v11 }
 0x180   : > { %2254 = vmatprep.subr.bf16.mxu0 %v2439_v1 }
 0x181   : > { %2235 = vmatpush3.bf16.msra.mxu1 %v2367_v2 }
 0x182   : > { %2236 = vmatprep.subr.bf16.mxu1 %v2439_v1 }
 0x183   : > { %2255 = vmatpush3.bf16.msra.mxu0 %v2375_v12 }
 0x184   : > { %2256 = vmatprep.subr.bf16.mxu0 %v2439_v1 }
 0x185   : > { %2237 = vmatpush3.bf16.msra.mxu1 %v2368_v3 }
 0x187   : > { %2257 = vmatpush3.bf16.msra.mxu0 %v2376_v13 }
 0x188   : > { %2239 = vmatmul.mubr.bf16.vlgmr.msra.gmra.mxu1 %v1359_v5 }
 0x1e8   : > { %v1156_v14 = vpop.f32.mrf.mxu0 }
 0x1ea   : > { %v2180_v15 = vpop.f32.mrf.mxu0 }
 0x1ec   : > { %v1159_v16 = vpop.f32.mrf.mxu0 }
 0x1ee   : > { %v2181_v17 = vpop.f32.mrf.mxu0 }
 0x228   : > { %v1244_v18 = vpop.f32.mrf.mxu1 }
 0x229   : > { %v1351_v19 = vpop.f32.mrf.mxu0  ;;  %v1245_v26 = vadd.f32 %v1244_v18, %v1156_v14 }
 0x22a   : > { %v2200_v20 = vpop.f32.mrf.mxu1 }
 0x22b   : > { %v2220_v21 = vpop.f32.mrf.mxu0  ;;  %v1357_v1 = vadd.f32 %v1351_v19, %v1245_v26 }
 0x22c   : > { %v1247_v22 = vpop.f32.mrf.mxu1 }
 0x22d   : > { %v1354_v23 = vpop.f32.mrf.mxu0 }
 0x22e   : > { %v2201_v24 = vpop.f32.mrf.mxu1 }
 0x22f   : > { %v2221_v25 = vpop.f32.mrf.mxu0 }
 0x248   : > { %v1459_v27 = vpop.f32.mrf.mxu1 }
 0x249   : > { %v1465_v29 = vadd.f32 %v1459_v27, %v1357_v1 }
 0x24a   : > { %v2240_v30 = vpop.f32.mrf.mxu1 }
 0x24b   : > { %v1473_v31 = vadd.f32 %v1871_v28, %v1465_v29 }
 0x24c   : > { %v1462_v32 = vpop.f32.mrf.mxu1 }
 0x24d   : > { %vm1474_vm3 = vcmp.ge.f32.partialorder %v1473_v31, 0.0  ;;  %v1475_v33 = vmul.f32 0.2, %v1473_v31 }
 0x24e   : > { %v2241_v34 = vpop.f32.mrf.mxu1 }
 0x24f   : > { %v1476_v35 = vsel %vm1474_vm3, %v1473_v31, %v1475_v33 }
 0x250   : > { %v1477_v36 = vpack.c.bf16 %v1476_v35, %v1476_v35 }
 0x252   : > { %2259 = vmatmul.mubr.bf16.vlgmr.msra.gmra.mxu0 %v1477_v36 }
 0x312   : > { %v1583_v38 = vpop.f32.mrf.mxu0 }
 0x313   : > { %v1584_v39 = vadd.f32 %v1872_v37, %v1583_v38 }
 0x314   : > { %v2260_v40 = vpop.f32.mrf.mxu0 }
 0x315   : > { %1589 = vst [vmem:[%s389_s27] sm:$0xf] %v1584_v39 }
 0x316   : > { %v1586_v41 = vpop.f32.mrf.mxu0 }
 0x317   : > { %2390 = shalt.err (!%p2387_p3)
}
 0x318   : > { %s2391_s11 = scalar_lea.hbm %s3063_s25, 64  ;;  %s2395_s20 = scalar_lea.hbm %s3114_s10, 128 }
 0x319   : > { %p2392_p4 = scmp.ne.s32.totalorder %s3063_s25, %s2391_s11  ;;  %p2396_p9 = scmp.lt.s32.totalorder %s3063_s25, %s3114_s10 }
 0x31a   : > { %p2397_p10 = scmp.lt.s32.totalorder %s2395_s20, %s2391_s11 }
 0x31b   : > { %p2393_p7 = pnand %p2392_p4, %p2535_p5 }
 0x31c   : > { %p2398_p11 = por %p2397_p10, %p2396_p9 }
 0x31d   : > { %p2394_p8 = pneg %p2393_p7 }
 0x31f   : > { %p2399_p12 = pnand %p2398_p11, %p2394_p8 }
 0x321   : > { %2402 = shalt.err (!%p2399_p12)
}
 0x322   : > { %2262 = dma.vmem_to_hbm [thread:$0]  (%p2535_p5), %s3065_s30, 64, %s3063_s25, %s1591_s26   ;;  %v2261_v42 = vpop.f32.mrf.mxu0 }
 0x323 PF: > { %p2268_p13 = scmp.ge.s32.totalorder %s2437_s16, 2  ;;  %s1616_s12 = sand.u32 1, %s2425_s13  }
 0x324   : > { %s1617_s29 = scalar_lea.sflag [#allocation5], %s1616_s12 }
 0x325   : > { %p2265_p0 = pnand %p2268_p13, %p2539_p6 }
 0x327   : > { %p2266_p1 = pneg %p2265_p0 }
 0x329   : > { %2420 = dma.done.wait (%p2266_p1), %s1617_s29, 64  }
 0x32a   : > { %2422 = vsyncadd (%p2266_p1), %s1617_s29, 4294967232  ;;  %p20_p2 = scmp.ge.s32.totalorder %s2522_s19, 4   ;;  %s3117_s13 = smov %s2429_s14 }
 0x32b   : > { %s3118_s14 = smov %s2433_s15  ;;  %s3119_s15 = smov %s2533_s22 }
 0x32c   : > { %s3120_s16 = smov %s2522_s19  ;;  %22 = sbr.rel (!%p20_p2) target bundleno = 3 (0x3), region = 110 }
 0x331   :  { %1622 = vsyncpa [#allocation5], 1 }
 0x332   :  { %1624 = vsyncpa [#allocation5 + $0x1], 1 }

</bundles_post_ra>
